<compile_context>
chip_gen: v7x
topology: tpu7x:2x2x1
jax: 0.10.0
libtpu: 0.0.40
codegen_flags: <defaults>
</compile_context>

<pallas_src>
import jax
import jax.numpy as jnp
from jax.experimental import pallas as pl
from jax.experimental.pallas import tpu as pltpu

BN_EPS = 0.001
LANE = 128

_VMEM = pl.BlockSpec(memory_space=pltpu.MemorySpace.VMEM)


def _round_up(n, m=LANE):
    return ((n + m - 1) // m) * m


# ----------------------------- Fused Pallas kernel --------------------------

def make_fused_kernel(n_blocks):
    """Fused forward: n_blocks x (Linear -> BatchNorm1d(batch stats) -> ReLU)
    followed by the classifier Linear. All tiles are whole-array VMEM blocks.

    Ref layout (inputs then output):
      x_ref                       (B, D0p)        f32
      [w_i, gamma_i, beta_i] * n  (Dip, Dop) bf16, (1, Dop) f32, (1, Dop) f32
      cw_ref, cb_ref              (Dlp, Dcp) bf16, (1, Dcp) f32
      o_ref                       (B, Dcp)        f32
    """
    def kernel(*refs):
        x_ref = refs[0]
        cw_ref = refs[1 + 3 * n_blocks]
        cb_ref = refs[2 + 3 * n_blocks]
        o_ref = refs[3 + 3 * n_blocks]

        h = x_ref[...]                      # f32 activations
        inv_b = jnp.float32(1.0 / h.shape[0])

        # Static unroll over layers: lets the scheduler overlap layer k+1's
        # weight use with layer k's BN/ReLU epilogue.
        for i in range(n_blocks):
            w_ref = refs[1 + 3 * i]
            gamma_ref = refs[2 + 3 * i]
            beta_ref = refs[3 + 3 * i]

            # MXU: bf16 x bf16 -> f32 accumulation. No bias: it cancels
            # exactly against the batch-mean subtraction below.
            y = jnp.dot(h.astype(jnp.bfloat16), w_ref[...],
                        preferred_element_type=jnp.float32)

            # BatchNorm1d(track_running_stats=False, eps=1e-3): batch stats,
            # biased variance, one-pass form (clamped to avoid cancellation).
            mu = jnp.sum(y, axis=0, keepdims=True) * inv_b
            ex2 = jnp.sum(y * y, axis=0, keepdims=True) * inv_b
            var = jnp.maximum(ex2 - mu * mu, 0.0)
            y_hat = (y - mu) * jax.lax.rsqrt(var + jnp.float32(BN_EPS))

            # Affine + ReLU (f32 VPU path).
            h = jnp.maximum(gamma_ref[...] * y_hat + beta_ref[...], 0.0)

        # Classifier: plain Linear (bias kept here).
        o_ref[...] = (jnp.dot(h.astype(jnp.bfloat16), cw_ref[...],
                              preferred_element_type=jnp.float32)
                      + cb_ref[...])

    return kernel


# ----------------------------- Init (matches fc_init_) ----------------------

def init_omniglot_fc(key, input_size, output_size, sizes=None):
    """weights ~ truncnorm(-2,2)*0.01, biases = 0, BN gamma = 1, beta = 0."""
    if sizes is None:
        sizes = [256, 128, 64, 64]
    dims = [input_size] + list(sizes)
    params = {"blocks": [], "sizes": list(sizes)}
    for d_in, d_out in zip(dims[:-1], dims[1:]):
        key, wk = jax.random.split(key)
        w = (jax.random.truncated_normal(wk, -2.0, 2.0, (d_out, d_in),
                                         dtype=jnp.float32) * 0.01)
        b = jnp.zeros((1, d_out), jnp.float32)       # kept for parity; cancels in BN
        gamma = jnp.ones((1, d_out), jnp.float32)
        beta = jnp.zeros((1, d_out), jnp.float32)
        params["blocks"].append((w, b, gamma, beta))
    key, wk = jax.random.split(key)
    cw = (jax.random.truncated_normal(wk, -2.0, 2.0, (output_size, sizes[-1]),
                                      dtype=jnp.float32) * 0.01)
    cb = jnp.zeros((1, output_size), jnp.float32)
    params["classifier"] = (cw, cb)
    return params


# ----------------------------- Forward wrapper -------------------------------

def omniglot_fc_forward(params, x):
    """Flatten -> fused [LinearBlock]*n -> Linear, all in one pallas_call."""
    B = x.shape[0]
    h = x.reshape(B, -1).astype(jnp.float32)        # l2l.nn.Flatten()

    n_blocks = len(params["blocks"])
    din = h.shape[1]
    prev_p = _round_up(din)
    h = jnp.pad(h, ((0, 0), (0, prev_p - din)))     # zero-pad features to 128k

    inputs = [h]
    for (w, _b, gamma, beta) in params["blocks"]:
        d_out, d_in = w.shape
        dout_p = _round_up(d_out)
        # transpose -> (Din, Dout), zero-pad both dims, pre-cast to bf16.
        wt = jnp.pad(w.T, ((0, prev_p - d_in), (0, dout_p - d_out))
                     ).astype(jnp.bfloat16)
        g = jnp.pad(gamma, ((0, 0), (0, dout_p - d_out)))
        bt = jnp.pad(beta, ((0, 0), (0, dout_p - d_out)))   # padded beta = 0
        inputs += [wt, g, bt]
        prev_p = dout_p

    cw, cb = params["classifier"]
    d_cls, d_last = cw.shape
    dcls_p = _round_up(d_cls)
    cwt = jnp.pad(cw.T, ((0, prev_p - d_last), (0, dcls_p - d_cls))
                  ).astype(jnp.bfloat16)
    cbp = jnp.pad(cb, ((0, 0), (0, dcls_p - d_cls)))
    inputs += [cwt, cbp]

    out = pl.pallas_call(
        make_fused_kernel(n_blocks),
        out_shape=jax.ShapeDtypeStruct((B, dcls_p), jnp.float32),
        in_specs=[_VMEM] * len(inputs),
        out_specs=_VMEM,
    )(*inputs)

    return out[:, :d_cls]                           # crop padded classes


# ----------------------------- Main ------------------------------------------

if __name__ == "__main__":
    key = jax.random.PRNGKey(0)
    key, xk, pk = jax.random.split(key, 3)

    # Small shapes consistent with the module: NCHW input flattened to
    # input_size = 1*8*8 = 64; hidden sizes [32, 32, 32]; 16 output classes.
    B, C, H, W = 8, 1, 8, 8
    input_size = C * H * W
    output_size = 16
    sizes = [32, 32, 32]

    x = jax.random.normal(xk, (B, C, H, W), dtype=jnp.float32)
    params = init_omniglot_fc(pk, input_size, output_size, sizes)

    out = omniglot_fc_forward(params, x)
    out = jax.block_until_ready(out)
    assert out.shape == (B, output_size)
    assert bool(jnp.all(jnp.isfinite(out)))
    print("KERNEL_OK")
</pallas_src>

<mosaic_0001>
module attributes {stable_mosaic.version = 11 : i64} {
  func.func @kernel(%arg0: memref<8x128xf32, #tpu.memory_space<vmem>>, %arg1: memref<128x128xbf16, #tpu.memory_space<vmem>>, %arg2: memref<1x128xf32, #tpu.memory_space<vmem>>, %arg3: memref<1x128xf32, #tpu.memory_space<vmem>>, %arg4: memref<128x128xbf16, #tpu.memory_space<vmem>>, %arg5: memref<1x128xf32, #tpu.memory_space<vmem>>, %arg6: memref<1x128xf32, #tpu.memory_space<vmem>>, %arg7: memref<128x128xbf16, #tpu.memory_space<vmem>>, %arg8: memref<1x128xf32, #tpu.memory_space<vmem>>, %arg9: memref<1x128xf32, #tpu.memory_space<vmem>>, %arg10: memref<128x128xbf16, #tpu.memory_space<vmem>>, %arg11: memref<1x128xf32, #tpu.memory_space<vmem>>, %arg12: memref<8x128xf32, #tpu.memory_space<vmem>>) attributes {dimension_semantics = [], scalar_prefetch = 0 : i64, scratch_operands = 0 : i64, tpu.core_type = #tpu.core_type<tc>} {
    %c0 = arith.constant 0 : index
    %c0_0 = arith.constant 0 : index
    %0 = vector.load %arg0[%c0, %c0_0] : memref<8x128xf32, #tpu.memory_space<vmem>>, vector<8x128xf32>
    %1 = arith.truncf %0 : vector<8x128xf32> to vector<8x128xbf16>
    %c0_1 = arith.constant 0 : index
    %c0_2 = arith.constant 0 : index
    %2 = vector.load %arg1[%c0_1, %c0_2] : memref<128x128xbf16, #tpu.memory_space<vmem>>, vector<128x128xbf16>
    %cst = arith.constant dense<0.000000e+00> : vector<8x128xf32>
    %3 = tpu.matmul %1, %2, %cst {dimension_numbers = #tpu.dot_dimension_numbers<[1], [0], [0], [1], [0, 0, 1, 1], [], []>} : vector<8x128xbf16>, vector<128x128xbf16>, vector<8x128xf32> -> vector<8x128xf32>
    %cst_3 = arith.constant dense<0.000000e+00> : vector<128xf32>
    %4 = vector.multi_reduction <add>, %3, %cst_3 [0] : vector<8x128xf32> to vector<128xf32>
    %5 = vector.shape_cast %4 : vector<128xf32> to vector<1x128xf32>
    %cst_4 = arith.constant 1.250000e-01 : f32
    %6 = vector.broadcast %cst_4 : f32 to vector<1x128xf32>
    %7 = arith.mulf %5, %6 : vector<1x128xf32>
    %8 = arith.mulf %3, %3 : vector<8x128xf32>
    %cst_5 = arith.constant dense<0.000000e+00> : vector<128xf32>
    %9 = vector.multi_reduction <add>, %8, %cst_5 [0] : vector<8x128xf32> to vector<128xf32>
    %10 = vector.shape_cast %9 : vector<128xf32> to vector<1x128xf32>
    %cst_6 = arith.constant 1.250000e-01 : f32
    %11 = vector.broadcast %cst_6 : f32 to vector<1x128xf32>
    %12 = arith.mulf %10, %11 : vector<1x128xf32>
    %13 = arith.mulf %7, %7 : vector<1x128xf32>
    %14 = arith.subf %12, %13 : vector<1x128xf32>
    %cst_7 = arith.constant 0.000000e+00 : f32
    %15 = vector.broadcast %cst_7 : f32 to vector<1x128xf32>
    %16 = arith.maximumf %14, %15 : vector<1x128xf32>
    %17 = vector.broadcast %7 : vector<1x128xf32> to vector<8x128xf32>
    %18 = arith.subf %3, %17 : vector<8x128xf32>
    %cst_8 = arith.constant 1.000000e-03 : f32
    %19 = vector.broadcast %cst_8 : f32 to vector<1x128xf32>
    %20 = arith.addf %16, %19 : vector<1x128xf32>
    %21 = math.rsqrt %20 : vector<1x128xf32>
    %22 = vector.broadcast %21 : vector<1x128xf32> to vector<8x128xf32>
    %23 = arith.mulf %18, %22 : vector<8x128xf32>
    %c0_9 = arith.constant 0 : index
    %c0_10 = arith.constant 0 : index
    %24 = vector.load %arg2[%c0_9, %c0_10] : memref<1x128xf32, #tpu.memory_space<vmem>>, vector<1x128xf32>
    %25 = vector.broadcast %24 : vector<1x128xf32> to vector<8x128xf32>
    %26 = arith.mulf %25, %23 : vector<8x128xf32>
    %c0_11 = arith.constant 0 : index
    %c0_12 = arith.constant 0 : index
    %27 = vector.load %arg3[%c0_11, %c0_12] : memref<1x128xf32, #tpu.memory_space<vmem>>, vector<1x128xf32>
    %28 = vector.broadcast %27 : vector<1x128xf32> to vector<8x128xf32>
    %29 = arith.addf %26, %28 : vector<8x128xf32>
    %cst_13 = arith.constant 0.000000e+00 : f32
    %30 = vector.broadcast %cst_13 : f32 to vector<8x128xf32>
    %31 = arith.maximumf %29, %30 : vector<8x128xf32>
    %32 = arith.truncf %31 : vector<8x128xf32> to vector<8x128xbf16>
    %c0_14 = arith.constant 0 : index
    %c0_15 = arith.constant 0 : index
    %33 = vector.load %arg4[%c0_14, %c0_15] : memref<128x128xbf16, #tpu.memory_space<vmem>>, vector<128x128xbf16>
    %cst_16 = arith.constant dense<0.000000e+00> : vector<8x128xf32>
    %34 = tpu.matmul %32, %33, %cst_16 {dimension_numbers = #tpu.dot_dimension_numbers<[1], [0], [0], [1], [0, 0, 1, 1], [], []>} : vector<8x128xbf16>, vector<128x128xbf16>, vector<8x128xf32> -> vector<8x128xf32>
    %cst_17 = arith.constant dense<0.000000e+00> : vector<128xf32>
    %35 = vector.multi_reduction <add>, %34, %cst_17 [0] : vector<8x128xf32> to vector<128xf32>
    %36 = vector.shape_cast %35 : vector<128xf32> to vector<1x128xf32>
    %cst_18 = arith.constant 1.250000e-01 : f32
    %37 = vector.broadcast %cst_18 : f32 to vector<1x128xf32>
    %38 = arith.mulf %36, %37 : vector<1x128xf32>
    %39 = arith.mulf %34, %34 : vector<8x128xf32>
    %cst_19 = arith.constant dense<0.000000e+00> : vector<128xf32>
    %40 = vector.multi_reduction <add>, %39, %cst_19 [0] : vector<8x128xf32> to vector<128xf32>
    %41 = vector.shape_cast %40 : vector<128xf32> to vector<1x128xf32>
    %cst_20 = arith.constant 1.250000e-01 : f32
    %42 = vector.broadcast %cst_20 : f32 to vector<1x128xf32>
    %43 = arith.mulf %41, %42 : vector<1x128xf32>
    %44 = arith.mulf %38, %38 : vector<1x128xf32>
    %45 = arith.subf %43, %44 : vector<1x128xf32>
    %cst_21 = arith.constant 0.000000e+00 : f32
    %46 = vector.broadcast %cst_21 : f32 to vector<1x128xf32>
    %47 = arith.maximumf %45, %46 : vector<1x128xf32>
    %48 = vector.broadcast %38 : vector<1x128xf32> to vector<8x128xf32>
    %49 = arith.subf %34, %48 : vector<8x128xf32>
    %cst_22 = arith.constant 1.000000e-03 : f32
    %50 = vector.broadcast %cst_22 : f32 to vector<1x128xf32>
    %51 = arith.addf %47, %50 : vector<1x128xf32>
    %52 = math.rsqrt %51 : vector<1x128xf32>
    %53 = vector.broadcast %52 : vector<1x128xf32> to vector<8x128xf32>
    %54 = arith.mulf %49, %53 : vector<8x128xf32>
    %c0_23 = arith.constant 0 : index
    %c0_24 = arith.constant 0 : index
    %55 = vector.load %arg5[%c0_23, %c0_24] : memref<1x128xf32, #tpu.memory_space<vmem>>, vector<1x128xf32>
    %56 = vector.broadcast %55 : vector<1x128xf32> to vector<8x128xf32>
    %57 = arith.mulf %56, %54 : vector<8x128xf32>
    %c0_25 = arith.constant 0 : index
    %c0_26 = arith.constant 0 : index
    %58 = vector.load %arg6[%c0_25, %c0_26] : memref<1x128xf32, #tpu.memory_space<vmem>>, vector<1x128xf32>
    %59 = vector.broadcast %58 : vector<1x128xf32> to vector<8x128xf32>
    %60 = arith.addf %57, %59 : vector<8x128xf32>
    %cst_27 = arith.constant 0.000000e+00 : f32
    %61 = vector.broadcast %cst_27 : f32 to vector<8x128xf32>
    %62 = arith.maximumf %60, %61 : vector<8x128xf32>
    %63 = arith.truncf %62 : vector<8x128xf32> to vector<8x128xbf16>
    %c0_28 = arith.constant 0 : index
    %c0_29 = arith.constant 0 : index
    %64 = vector.load %arg7[%c0_28, %c0_29] : memref<128x128xbf16, #tpu.memory_space<vmem>>, vector<128x128xbf16>
    %cst_30 = arith.constant dense<0.000000e+00> : vector<8x128xf32>
    %65 = tpu.matmul %63, %64, %cst_30 {dimension_numbers = #tpu.dot_dimension_numbers<[1], [0], [0], [1], [0, 0, 1, 1], [], []>} : vector<8x128xbf16>, vector<128x128xbf16>, vector<8x128xf32> -> vector<8x128xf32>
    %cst_31 = arith.constant dense<0.000000e+00> : vector<128xf32>
    %66 = vector.multi_reduction <add>, %65, %cst_31 [0] : vector<8x128xf32> to vector<128xf32>
    %67 = vector.shape_cast %66 : vector<128xf32> to vector<1x128xf32>
    %cst_32 = arith.constant 1.250000e-01 : f32
    %68 = vector.broadcast %cst_32 : f32 to vector<1x128xf32>
    %69 = arith.mulf %67, %68 : vector<1x128xf32>
    %70 = arith.mulf %65, %65 : vector<8x128xf32>
    %cst_33 = arith.constant dense<0.000000e+00> : vector<128xf32>
    %71 = vector.multi_reduction <add>, %70, %cst_33 [0] : vector<8x128xf32> to vector<128xf32>
    %72 = vector.shape_cast %71 : vector<128xf32> to vector<1x128xf32>
    %cst_34 = arith.constant 1.250000e-01 : f32
    %73 = vector.broadcast %cst_34 : f32 to vector<1x128xf32>
    %74 = arith.mulf %72, %73 : vector<1x128xf32>
    %75 = arith.mulf %69, %69 : vector<1x128xf32>
    %76 = arith.subf %74, %75 : vector<1x128xf32>
    %cst_35 = arith.constant 0.000000e+00 : f32
    %77 = vector.broadcast %cst_35 : f32 to vector<1x128xf32>
    %78 = arith.maximumf %76, %77 : vector<1x128xf32>
    %79 = vector.broadcast %69 : vector<1x128xf32> to vector<8x128xf32>
    %80 = arith.subf %65, %79 : vector<8x128xf32>
    %cst_36 = arith.constant 1.000000e-03 : f32
    %81 = vector.broadcast %cst_36 : f32 to vector<1x128xf32>
    %82 = arith.addf %78, %81 : vector<1x128xf32>
    %83 = math.rsqrt %82 : vector<1x128xf32>
    %84 = vector.broadcast %83 : vector<1x128xf32> to vector<8x128xf32>
    %85 = arith.mulf %80, %84 : vector<8x128xf32>
    %c0_37 = arith.constant 0 : index
    %c0_38 = arith.constant 0 : index
    %86 = vector.load %arg8[%c0_37, %c0_38] : memref<1x128xf32, #tpu.memory_space<vmem>>, vector<1x128xf32>
    %87 = vector.broadcast %86 : vector<1x128xf32> to vector<8x128xf32>
    %88 = arith.mulf %87, %85 : vector<8x128xf32>
    %c0_39 = arith.constant 0 : index
    %c0_40 = arith.constant 0 : index
    %89 = vector.load %arg9[%c0_39, %c0_40] : memref<1x128xf32, #tpu.memory_space<vmem>>, vector<1x128xf32>
    %90 = vector.broadcast %89 : vector<1x128xf32> to vector<8x128xf32>
    %91 = arith.addf %88, %90 : vector<8x128xf32>
    %cst_41 = arith.constant 0.000000e+00 : f32
    %92 = vector.broadcast %cst_41 : f32 to vector<8x128xf32>
    %93 = arith.maximumf %91, %92 : vector<8x128xf32>
    %94 = arith.truncf %93 : vector<8x128xf32> to vector<8x128xbf16>
    %c0_42 = arith.constant 0 : index
    %c0_43 = arith.constant 0 : index
    %95 = vector.load %arg10[%c0_42, %c0_43] : memref<128x128xbf16, #tpu.memory_space<vmem>>, vector<128x128xbf16>
    %cst_44 = arith.constant dense<0.000000e+00> : vector<8x128xf32>
    %96 = tpu.matmul %94, %95, %cst_44 {dimension_numbers = #tpu.dot_dimension_numbers<[1], [0], [0], [1], [0, 0, 1, 1], [], []>} : vector<8x128xbf16>, vector<128x128xbf16>, vector<8x128xf32> -> vector<8x128xf32>
    %c0_45 = arith.constant 0 : index
    %c0_46 = arith.constant 0 : index
    %97 = vector.load %arg11[%c0_45, %c0_46] : memref<1x128xf32, #tpu.memory_space<vmem>>, vector<1x128xf32>
    %98 = vector.broadcast %97 : vector<1x128xf32> to vector<8x128xf32>
    %99 = arith.addf %96, %98 : vector<8x128xf32>
    %c0_47 = arith.constant 0 : index
    %c0_48 = arith.constant 0 : index
    %100 = vector.load %arg12[%c0_47, %c0_48] : memref<8x128xf32, #tpu.memory_space<vmem>>, vector<8x128xf32>
    tpu.vector_store %arg12[%c0_47, %c0_48], %99 {strides = array<i32>} : memref<8x128xf32, #tpu.memory_space<vmem>>, vector<8x128xf32>,
    return
  }
}

</mosaic_0001>

<bundles_post_ra>
// kernel: tpu_custom_call.1
= control target key start
LH: loop header
LB: loop body
LE: loop exit
PB: predicated region body
PF: predicated region fallthrough
CT: control target
= control target key end

     0   :  { %17 = vsyncpa [#allocation3], 0  ;;  %s1235_s0 = inlined_call_operand.hbm [shape: f32[8,128], index: 0, kind: input, shape index: {}]   ;;  %s1236_s1 = inlined_call_operand.hbm [shape: bf16[128,128], index: 1, kind: input, shape index: {}]   ;;  %s1237_s2 = inlined_call_operand.vmem [shape: f32[1,128], index: 2, kind: input, shape index: {}]   ;;  %s1238_s3 = inlined_call_operand.vmem [shape: f32[1,128], index: 3, kind: input, shape index: {}]   ;;  %s1239_s4 = inlined_call_operand.hbm [shape: bf16[128,128], index: 4, kind: input, shape index: {}]   ;;  %s1240_s5 = inlined_call_operand.vmem [shape: f32[1,128], index: 5, kind: input, shape index: {}]   ;;  %s1241_s6 = inlined_call_operand.vmem [shape: f32[1,128], index: 6, kind: input, shape index: {}]   ;;  %s1242_s7 = inlined_call_operand.hbm [shape: bf16[128,128], index: 7, kind: input, shape index: {}]   ;;  %s1243_s8 = inlined_call_operand.vmem [shape: f32[1,128], index: 8, kind: input, shape index: {}]   ;;  %s1244_s9 = inlined_call_operand.vmem [shape: f32[1,128], index: 9, kind: input, shape index: {}]   ;;  %s1245_s10 = inlined_call_operand.hbm [shape: bf16[128,128], index: 10, kind: input, shape index: {}]   ;;  %s1246_s11 = inlined_call_operand.vmem [shape: f32[1,128], index: 11, kind: input, shape index: {}]   ;;  %s1247_s12 = inlined_call_operand.hbm [shape: f32[8,128], index: 12, kind: output, shape index: {}]  }
   0x1   :  { %18 = vsyncpa [#allocation6], 0 }
   0x2   :  { %19 = vsyncpa [#allocation9], 0 }
   0x3   :  { %20 = vsyncpa [#allocation4], 0  ;;  %s1015_s21 = smov [#allocation5]   ;;  %s875_s25 = scalar_lea.hbm %s1236_s1, 1024 }
   0x4   :  { %s36_s22 = sshll.u32 %s1015_s21, 4  ;;  %p876_p0 = scmp.ne.s32.totalorder %s1236_s1, %s875_s25  ;;  %s37_s22 = int_to_ptr.vmem [resolvable:$true] %s36_s22 }
   0x5   :  { %p879_p1 = scmp.lt.u32.totalorder %s875_s25, %s1236_s1 }
   0x7   :  { %p881_p2 = pnand %p879_p1, %p876_p0 }
   0x9   :  { %884 = shalt.err (!%p881_p2)
}
   0xa   :  { %s885_s30 = scalar_lea.vmem %s37_s22, 1024  ;;  %p890_p4 = scmp.lt.s32.totalorder %s37_s22, %s37_s22 }
   0xb   :  { %p886_p3 = scmp.ne.s32.totalorder %s37_s22, %s885_s30  ;;  %p891_p5 = scmp.lt.s32.totalorder %s885_s30, %s885_s30 }
   0xd   :  { %p892_p6 = por %p891_p5, %p890_p4 }
   0xf   :  { %p893_p7 = pnand %p892_p6, %p886_p3 }
  0x11   :  { %896 = shalt.err (!%p893_p7)
}
  0x12   :  { %s1016_s13 = smov 64   ;;  %s1017_s14 = smov 4  }
  0x13   :  { %42 = dma.hbm_to_vmem [thread:$0]  %s1236_s1, 1024, %s37_s22, [#allocation6], %s1016_s13, %s1016_s13, %s1017_s14  }
  0x14   :  { %s1018_s17 = smov [#allocation8]   ;;  %s1019_s19 = smov [#allocation2]  }
  0x15   :  { %s68_s18 = sshll.u32 %s1018_s17, 4  ;;  %s27_s20 = sshll.u32 %s1019_s19, 4  ;;  %s69_s18 = int_to_ptr.vmem [resolvable:$true] %s68_s18  ;;  %s28_s20 = int_to_ptr.vmem [resolvable:$true] %s27_s20 }
  0x16   :  { %s897_s24 = scalar_lea.hbm %s1242_s7, 1024 }
  0x17   :  { %p898_p8 = scmp.ne.s32.totalorder %s1242_s7, %s897_s24  ;;  %p901_p9 = scmp.lt.u32.totalorder %s897_s24, %s1242_s7 }
  0x19   :  { %p903_p10 = pnand %p901_p9, %p898_p8 }
  0x1b   :  { %906 = shalt.err (!%p903_p10)
}
  0x1c   :  { %s907_s1 = scalar_lea.vmem %s69_s18, 1024  ;;  %p912_p12 = scmp.lt.s32.totalorder %s69_s18, %s69_s18 }
  0x1d   :  { %p908_p11 = scmp.ne.s32.totalorder %s69_s18, %s907_s1  ;;  %p913_p13 = scmp.lt.s32.totalorder %s907_s1, %s907_s1 }
  0x1f   :  { %p914_p0 = por %p913_p13, %p912_p12 }
  0x21   :  { %p915_p1 = pnand %p914_p0, %p908_p11 }
  0x23   :  { %918 = shalt.err (!%p915_p1)
}
  0x24   :  { %74 = dma.hbm_to_vmem [thread:$0]  %s1242_s7, 1024, %s69_s18, [#allocation9], %s1016_s13, %s1016_s13, %s1017_s14  }
  0x25   :  { %s919_s16 = scalar_lea.hbm %s1235_s0, 128 }
  0x26   :  { %p920_p2 = scmp.ne.s32.totalorder %s1235_s0, %s919_s16  ;;  %p923_p3 = scmp.lt.u32.totalorder %s919_s16, %s1235_s0 }
  0x28   :  { %p925_p4 = pnand %p923_p3, %p920_p2 }
  0x2a   :  { %928 = shalt.err (!%p925_p4)
}
  0x2b   :  { %s929_s24 = scalar_lea.vmem %s28_s20, 128  ;;  %p934_p6 = scmp.lt.s32.totalorder %s28_s20, %s28_s20 }
  0x2c   :  { %p930_p5 = scmp.ne.s32.totalorder %s28_s20, %s929_s24  ;;  %p935_p7 = scmp.lt.s32.totalorder %s929_s24, %s929_s24 }
  0x2e   :  { %p936_p8 = por %p935_p7, %p934_p6 }
  0x30   :  { %p937_p9 = pnand %p936_p8, %p930_p5 }
  0x32   :  { %940 = shalt.err (!%p937_p9)
}
  0x33   :  { %30 = dma.hbm_to_vmem [thread:$0]  %s1235_s0, 128, %s28_s20, [#allocation3]  }
  0x34   :  { %s1020_s25 = smov [#allocation7]   ;;  %s1021_s27 = smov [#allocation10]  }
  0x35   :  { %s52_s26 = sshll.u32 %s1020_s25, 4  ;;  %s84_s28 = sshll.u32 %s1021_s27, 4  ;;  %s53_s26 = int_to_ptr.vmem [resolvable:$true] %s52_s26  ;;  %s85_s28 = int_to_ptr.vmem [resolvable:$true] %s84_s28 }
  0x36   :  { %s941_s29 = scalar_lea.hbm %s1239_s4, 1024 }
  0x37   :  { %p942_p10 = scmp.ne.s32.totalorder %s1239_s4, %s941_s29  ;;  %p945_p11 = scmp.lt.u32.totalorder %s941_s29, %s1239_s4 }
  0x39   :  { %p947_p12 = pnand %p945_p11, %p942_p10 }
  0x3b   :  { %950 = shalt.err (!%p947_p12)
}
  0x3c   :  { %s951_s0 = scalar_lea.vmem %s53_s26, 1024  ;;  %p956_p0 = scmp.lt.s32.totalorder %s53_s26, %s53_s26 }
  0x3d   :  { %p952_p13 = scmp.ne.s32.totalorder %s53_s26, %s951_s0  ;;  %p957_p1 = scmp.lt.s32.totalorder %s951_s0, %s951_s0 }
  0x3f   :  { %p958_p2 = por %p957_p1, %p956_p0 }
  0x41   :  { %p959_p3 = pnand %p958_p2, %p952_p13 }
  0x43   :  { %962 = shalt.err (!%p959_p3)
}
  0x44   :  { %58 = dma.hbm_to_vmem [thread:$0]  %s1239_s4, 1024, %s53_s26, [#allocation6], %s1016_s13, %s1016_s13, %s1017_s14  }
  0x45   :  { %s963_s24 = scalar_lea.hbm %s1245_s10, 1024 }
  0x46   :  { %p964_p4 = scmp.ne.s32.totalorder %s1245_s10, %s963_s24  ;;  %p967_p5 = scmp.lt.u32.totalorder %s963_s24, %s1245_s10 }
  0x48   :  { %p969_p6 = pnand %p967_p5, %p964_p4 }
  0x4a   :  { %972 = shalt.err (!%p969_p6)
}
  0x4b   :  { %s973_s1 = scalar_lea.vmem %s85_s28, 1024  ;;  %p978_p8 = scmp.lt.s32.totalorder %s85_s28, %s85_s28 }
  0x4c   :  { %p974_p7 = scmp.ne.s32.totalorder %s85_s28, %s973_s1  ;;  %p979_p9 = scmp.lt.s32.totalorder %s973_s1, %s973_s1 }
  0x4e   :  { %p980_p10 = por %p979_p9, %p978_p8 }
  0x50   :  { %p981_p11 = pnand %p980_p10, %p974_p7 }
  0x52   :  { %984 = shalt.err (!%p981_p11)
}
  0x53   :  { %90 = dma.hbm_to_vmem [thread:$0]  %s1245_s10, 1024, %s85_s28, [#allocation9], %s1016_s13, %s1016_s13, %s1017_s14  }
  0x54   :  { %1007 = dma.done.wait [#allocation3], 128  }
  0x55   :  { %1008 = vsyncadd [#allocation3], 4294967168 }
  0x56   :  { %1009 = dma.done.wait [#allocation6], 2048  }
  0x57   :  { %1010 = vsyncadd [#allocation6], 4294965248 }
  0x58   :  { %1011 = dma.done.wait [#allocation9], 2048  }
  0x59   :  { %1012 = vsyncadd [#allocation9], 4294965248  ;;  %v1022_v0 = vmov 0.0   ;;  %vm1023_vm0 = vmmov 0   ;;  %v837_v1 = vld [vmem:[#allocation5] sm:$0xff]   ;;  %v838_v2 = vld [vmem:[#allocation5 + $0x8] sm:$0xff]  }
  0x5a   :  { %747 = vmatprep.subr.bf16.mxu0 %v1022_v0  ;;  %763 = vmatprep.mubr.msk.bf16.mxu0 %vm1023_vm0, %v1022_v0  ;;  %v839_v3 = vld [vmem:[#allocation5 + $0x10] sm:$0xff]   ;;  %v840_v4 = vld [vmem:[#allocation5 + $0x18] sm:$0xff]   ;;  %v841_v5 = vld [vmem:[#allocation5 + $0x20] sm:$0xff]   ;;  %s1024_s0 = smov [#allocation11]  }
  0x5b   :  { %767 = vmatprep.subr.bf16.mxu1 %v1022_v0  ;;  %783 = vmatprep.mubr.msk.bf16.mxu1 %vm1023_vm0, %v1022_v0  ;;  %v842_v6 = vld [vmem:[#allocation5 + $0x28] sm:$0xff]   ;;  %v843_v7 = vld [vmem:[#allocation5 + $0x30] sm:$0xff]   ;;  %v844_v8 = vld [vmem:[#allocation5 + $0x38] sm:$0xff]   ;;  %s661_s20 = sshll.u32 %s1024_s0, 4  ;;  %s662_s20 = int_to_ptr.vmem [resolvable:$true] %s661_s20 }
  0x5c   :  { %748 = vmatpush3.bf16.msra.mxu0 %v837_v1  ;;  %v109_v9 = vld [vmem:[#allocation2] sm:$0xff]  ;;  %v845_v11 = vld [vmem:[#allocation7] sm:$0xff]   ;;  %v846_v12 = vld [vmem:[#allocation7 + $0x8] sm:$0xff]   ;;  %p990_p13 = scmp.lt.s32.totalorder %s662_s20, %s662_s20 }
  0x5d   :  { %749 = vmatprep.subr.bf16.mxu0 %v1022_v0  ;;  %v110_v10 = vpack.c.bf16 %v109_v9, %v109_v9  ;;  %768 = vmatpush3.bf16.msra.mxu1 %v845_v11  ;;  %v847_v13 = vld [vmem:[#allocation7 + $0x10] sm:$0xff]   ;;  %v848_v14 = vld [vmem:[#allocation7 + $0x18] sm:$0xff]   ;;  %v849_v15 = vld [vmem:[#allocation7 + $0x20] sm:$0xff]  }
  0x5e   :  { %769 = vmatprep.subr.bf16.mxu1 %v1022_v0  ;;  %v850_v16 = vld [vmem:[#allocation7 + $0x28] sm:$0xff]   ;;  %v851_v17 = vld [vmem:[#allocation7 + $0x30] sm:$0xff]   ;;  %v852_v18 = vld [vmem:[#allocation7 + $0x38] sm:$0xff]  }
  0x5f   :  { %v680_v44 = vld [vmem:[%s1237_s2] ss:$0 sm:$0xff]  ;;  %v853_v51 = vld [vmem:[#allocation8] sm:$0xff]   ;;  %v854_v52 = vld [vmem:[#allocation8 + $0x8] sm:$0xff]  }
  0x60   :  { %750 = vmatpush3.bf16.msra.mxu0 %v838_v2  ;;  %v681_v46 = vld [vmem:[%s1238_s3] ss:$0 sm:$0xff]  ;;  %v855_v53 = vld [vmem:[#allocation8 + $0x10] sm:$0xff]   ;;  %v857_v55 = vld [vmem:[#allocation8 + $0x20] sm:$0xff]  }
  0x61   :  { %751 = vmatprep.subr.bf16.mxu0 %v1022_v0  ;;  %770 = vmatpush3.bf16.msra.mxu1 %v846_v12  ;;  %v856_v54 = vld [vmem:[#allocation8 + $0x18] sm:$0xff]   ;;  %v858_v56 = vld [vmem:[#allocation8 + $0x28] sm:$0xff]   ;;  %v859_v57 = vld [vmem:[#allocation8 + $0x30] sm:$0xff]  }
  0x62   :  { %771 = vmatprep.subr.bf16.mxu1 %v1022_v0  ;;  %v860_v58 = vld [vmem:[#allocation8 + $0x38] sm:$0xff]  }
  0x64   :  { %752 = vmatpush3.bf16.msra.mxu0 %v839_v3 }
  0x65   :  { %753 = vmatprep.subr.bf16.mxu0 %v1022_v0  ;;  %772 = vmatpush3.bf16.msra.mxu1 %v847_v13 }
  0x66   :  { %773 = vmatprep.subr.bf16.mxu1 %v1022_v0 }
  0x68   :  { %754 = vmatpush3.bf16.msra.mxu0 %v840_v4 }
  0x69   :  { %755 = vmatprep.subr.bf16.mxu0 %v1022_v0  ;;  %774 = vmatpush3.bf16.msra.mxu1 %v848_v14 }
  0x6a   :  { %775 = vmatprep.subr.bf16.mxu1 %v1022_v0 }
  0x6c   :  { %756 = vmatpush3.bf16.msra.mxu0 %v841_v5 }
  0x6d   :  { %757 = vmatprep.subr.bf16.mxu0 %v1022_v0  ;;  %776 = vmatpush3.bf16.msra.mxu1 %v849_v15 }
  0x6e   :  { %777 = vmatprep.subr.bf16.mxu1 %v1022_v0 }
  0x70   :  { %758 = vmatpush3.bf16.msra.mxu0 %v842_v6 }
  0x71   :  { %759 = vmatprep.subr.bf16.mxu0 %v1022_v0  ;;  %778 = vmatpush3.bf16.msra.mxu1 %v850_v16 }
  0x72   :  { %779 = vmatprep.subr.bf16.mxu1 %v1022_v0 }
  0x74   :  { %760 = vmatpush3.bf16.msra.mxu0 %v843_v7 }
  0x75   :  { %761 = vmatprep.subr.bf16.mxu0 %v1022_v0  ;;  %780 = vmatpush3.bf16.msra.mxu1 %v851_v17 }
  0x76   :  { %781 = vmatprep.subr.bf16.mxu1 %v1022_v0 }
  0x78   :  { %762 = vmatpush3.bf16.msra.mxu0 %v844_v8 }
  0x79   :  { %787 = vmatprep.subr.bf16.mxu0 %v1022_v0  ;;  %782 = vmatpush3.bf16.msra.mxu1 %v852_v18 }
  0x7a   :  { %807 = vmatprep.subr.bf16.mxu1 %v1022_v0 }
  0x7b   :  { %764 = vmatmul.mubr.bf16.vlgmr.msra.gmra.mrb[0].mxu0 %v110_v10 }
  0x7c   :  { %803 = vmatprep.mubr.msk.bf16.mxu0 %vm1023_vm0, %v1022_v0  ;;  %788 = vmatpush3.bf16.msra.mxu0 %v853_v51 }
  0x7d   :  { %789 = vmatprep.subr.bf16.mxu0 %v1022_v0 }
  0x80   :  { %790 = vmatpush3.bf16.msra.mxu0 %v854_v52 }
  0x81   :  { %791 = vmatprep.subr.bf16.mxu0 %v1022_v0 }
  0x84   :  { %792 = vmatpush3.bf16.msra.mxu0 %v855_v53 }
  0x85   :  { %793 = vmatprep.subr.bf16.mxu0 %v1022_v0 }
  0x88   :  { %794 = vmatpush3.bf16.msra.mxu0 %v856_v54 }
  0x89   :  { %795 = vmatprep.subr.bf16.mxu0 %v1022_v0 }
  0x8c   :  { %796 = vmatpush3.bf16.msra.mxu0 %v857_v55 }
  0x8d   :  { %797 = vmatprep.subr.bf16.mxu0 %v1022_v0 }
  0x90   :  { %798 = vmatpush3.bf16.msra.mxu0 %v858_v56 }
  0x91   :  { %799 = vmatprep.subr.bf16.mxu0 %v1022_v0 }
  0x94   :  { %800 = vmatpush3.bf16.msra.mxu0 %v859_v57 }
  0x95   :  { %801 = vmatprep.subr.bf16.mxu0 %v1022_v0 }
  0x98   :  { %802 = vmatpush3.bf16.msra.mxu0 %v860_v58 }
 0x14e   :  { %v209_v19 = vpop.f32.mrb[0].mxu0 }
 0x14f   :  { %v215_v20 = vrot.slane %v209_v19, 4  ;;  %v222_v21 = vmul.f32 %v209_v19, %v209_v19  ;;  %v765_v22 = vpop.f32.mrb[1].mxu0 }
 0x150   :  { %v212_v23 = vpop.f32.mrb[2].mxu0 }
 0x151   :  { %v216_v24 = vadd.f32 %v215_v20, %v209_v19  ;;  %v223_v25 = vrot.slane %v222_v21, 4  ;;  %v766_v26 = vpop.f32.mrb[3].mxu0  ;;  %v691_v23 = vld [vmem:[%s1241_s6] ss:$0 sm:$0xff] }
 0x153   :  { %v217_v27 = vrot.slane %v216_v24, 2  ;;  %v224_v28 = vadd.f32 %v223_v25, %v222_v21  ;;  %v690_v21 = vld [vmem:[%s1240_s5] ss:$0 sm:$0xff] }
 0x155   :  { %v218_v29 = vadd.f32 %v217_v27, %v216_v24  ;;  %v225_v30 = vrot.slane %v224_v28, 2 }
 0x157   :  { %v219_v31 = vrot.slane %v218_v29, 1  ;;  %v226_v32 = vadd.f32 %v225_v30, %v224_v28  ;;  %v861_v28 = vld [vmem:[#allocation10] sm:$0xff]   ;;  %v863_v30 = vld [vmem:[#allocation10 + $0x10] sm:$0xff]  }
 0x159   :  { %v220_v33 = vadd.f32 %v219_v31, %v218_v29  ;;  %v227_v34 = vrot.slane %v226_v32, 1  ;;  %v862_v29 = vld [vmem:[#allocation10 + $0x8] sm:$0xff]   ;;  %v864_v31 = vld [vmem:[#allocation10 + $0x18] sm:$0xff]  }
 0x15b   :  { %v221_v35 = vmul.f32 0.125, %v220_v33  ;;  %v228_v36 = vadd.f32 %v227_v34, %v226_v32  ;;  %v865_v32 = vld [vmem:[#allocation10 + $0x20] sm:$0xff]   ;;  %v866_v33 = vld [vmem:[#allocation10 + $0x28] sm:$0xff]   ;;  %v867_v34 = vld [vmem:[#allocation10 + $0x30] sm:$0xff]  }
 0x15d   :  { %v229_v37 = vmul.f32 0.125, %v228_v36  ;;  %v230_v38 = vmul.f32 %v221_v35, %v221_v35  ;;  %v233_v42 = vsub.f32 %v209_v19, %v221_v35  ;;  %v868_v35 = vld [vmem:[#allocation10 + $0x38] sm:$0xff]  }
 0x15f   :  { %v231_v39 = vsub.f32 %v229_v37, %v230_v38 }
 0x161   :  { %v232_v40 = vmax.f32 %v231_v39, 0.0 }
 0x163   :  { %v234_v41 = vadd.f32 0.001, %v232_v40 }
 0x165   :  { %869 = vrsqrt.f32 %v234_v41 }
 0x16f   :  { %v870_v43 = vpop.eup %869 }
 0x170   :  { %v236_v45 = vmul.f32 %v870_v43, %v233_v42 }
 0x172   :  { %v244_v47 = vmul.f32 %v680_v44, %v236_v45 }
 0x174   :  { %v252_v48 = vadd.f32 %v681_v46, %v244_v47 }
 0x176   :  { %v253_v49 = vmax.f32 %v252_v48, 0.0 }
 0x178   :  { %v254_v50 = vpack.c.bf16 %v253_v49, %v253_v49 }
 0x17a   :  { %784 = vmatmul.mubr.bf16.vlgmr.msra.gmra.mrb[0].mxu1 %v254_v50 }
 0x17b   :  { %823 = vmatprep.mubr.msk.bf16.mxu1 %vm1023_vm0, %v1022_v0  ;;  %808 = vmatpush3.bf16.msra.mxu1 %v861_v28 }
 0x17c   :  { %809 = vmatprep.subr.bf16.mxu1 %v1022_v0 }
 0x17f   :  { %810 = vmatpush3.bf16.msra.mxu1 %v862_v29 }
 0x180   :  { %811 = vmatprep.subr.bf16.mxu1 %v1022_v0 }
 0x183   :  { %812 = vmatpush3.bf16.msra.mxu1 %v863_v30 }
 0x184   :  { %813 = vmatprep.subr.bf16.mxu1 %v1022_v0 }
 0x187   :  { %814 = vmatpush3.bf16.msra.mxu1 %v864_v31 }
 0x188   :  { %815 = vmatprep.subr.bf16.mxu1 %v1022_v0 }
 0x18b   :  { %816 = vmatpush3.bf16.msra.mxu1 %v865_v32 }
 0x18c   :  { %817 = vmatprep.subr.bf16.mxu1 %v1022_v0 }
 0x18f   :  { %818 = vmatpush3.bf16.msra.mxu1 %v866_v33 }
 0x190   :  { %819 = vmatprep.subr.bf16.mxu1 %v1022_v0 }
 0x193   :  { %820 = vmatpush3.bf16.msra.mxu1 %v867_v34 }
 0x194   :  { %821 = vmatprep.subr.bf16.mxu1 %v1022_v0 }
 0x197   :  { %822 = vmatpush3.bf16.msra.mxu1 %v868_v35 }
 0x24d   :  { %v353_v59 = vpop.f32.mrb[0].mxu1 }
 0x24e   :  { %v359_v60 = vrot.slane %v353_v59, 4  ;;  %v366_v61 = vmul.f32 %v353_v59, %v353_v59  ;;  %v785_v62 = vpop.f32.mrb[1].mxu1 }
 0x24f   :  { %v356_v63 = vpop.f32.mrb[2].mxu1  ;;  %v701_v62 = vld [vmem:[%s1244_s9] ss:$0 sm:$0xff] }
 0x250   :  { %v360_v1 = vadd.f32 %v359_v60, %v353_v59  ;;  %v367_v2 = vrot.slane %v366_v61, 4  ;;  %v786_v3 = vpop.f32.mrb[3].mxu1  ;;  %v700_v60 = vld [vmem:[%s1243_s8] ss:$0 sm:$0xff]  ;;  %s985_s8 = scalar_lea.vmem %s662_s20, 128 }
 0x251   :  { %p986_p12 = scmp.ne.s32.totalorder %s662_s20, %s985_s8  ;;  %p991_p0 = scmp.lt.s32.totalorder %s985_s8, %s985_s8 }
 0x252   :  { %v361_v4 = vrot.slane %v360_v1, 2  ;;  %v368_v5 = vadd.f32 %v367_v2, %v366_v61 }
 0x253   :  { %p992_p1 = por %p991_p0, %p990_p13 }
 0x254   :  { %v362_v6 = vadd.f32 %v361_v4, %v360_v1  ;;  %v369_v7 = vrot.slane %v368_v5, 2  ;;  %v702_v4 = vld [vmem:[%s1246_s11] ss:$0 sm:$0xff] }
 0x255   :  { %p993_p2 = pnand %p992_p1, %p986_p12 }
 0x256   :  { %v363_v8 = vrot.slane %v362_v6, 1  ;;  %v370_v9 = vadd.f32 %v369_v7, %v368_v5 }
 0x258   :  { %v364_v10 = vadd.f32 %v363_v8, %v362_v6  ;;  %v371_v11 = vrot.slane %v370_v9, 1 }
 0x25a   :  { %v365_v12 = vmul.f32 0.125, %v364_v10  ;;  %v372_v13 = vadd.f32 %v371_v11, %v370_v9 }
 0x25c   :  { %v373_v14 = vmul.f32 0.125, %v372_v13  ;;  %v374_v15 = vmul.f32 %v365_v12, %v365_v12  ;;  %v377_v19 = vsub.f32 %v353_v59, %v365_v12 }
 0x25e   :  { %v375_v16 = vsub.f32 %v373_v14, %v374_v15 }
 0x260   :  { %v376_v17 = vmax.f32 %v375_v16, 0.0 }
 0x262   :  { %v378_v18 = vadd.f32 0.001, %v376_v17 }
 0x264   :  { %871 = vrsqrt.f32 %v378_v18 }
 0x26e   :  { %v872_v20 = vpop.eup %871 }
 0x26f   :  { %v380_v22 = vmul.f32 %v872_v20, %v377_v19 }
 0x271   :  { %v388_v24 = vmul.f32 %v690_v21, %v380_v22 }
 0x273   :  { %v396_v25 = vadd.f32 %v691_v23, %v388_v24 }
 0x275   :  { %v397_v26 = vmax.f32 %v396_v25, 0.0 }
 0x277   :  { %v398_v27 = vpack.c.bf16 %v397_v26, %v397_v26 }
 0x279   :  { %804 = vmatmul.mubr.bf16.vlgmr.msra.gmra.mrb[4].mxu0 %v398_v27 }
 0x34c   :  { %v497_v36 = vpop.f32.mrb[4].mxu0 }
 0x34d   :  { %v503_v37 = vrot.slane %v497_v36, 4  ;;  %v510_v38 = vmul.f32 %v497_v36, %v497_v36  ;;  %v805_v39 = vpop.f32.mrb[5].mxu0 }
 0x34e   :  { %v500_v40 = vpop.f32.mrb[6].mxu0 }
 0x34f   :  { %v504_v41 = vadd.f32 %v503_v37, %v497_v36  ;;  %v511_v42 = vrot.slane %v510_v38, 4  ;;  %v806_v43 = vpop.f32.mrb[7].mxu0 }
 0x351   :  { %v505_v44 = vrot.slane %v504_v41, 2  ;;  %v512_v45 = vadd.f32 %v511_v42, %v510_v38 }
 0x353   :  { %v506_v46 = vadd.f32 %v505_v44, %v504_v41  ;;  %v513_v47 = vrot.slane %v512_v45, 2 }
 0x355   :  { %v507_v48 = vrot.slane %v506_v46, 1  ;;  %v514_v49 = vadd.f32 %v513_v47, %v512_v45 }
 0x357   :  { %v508_v50 = vadd.f32 %v507_v48, %v506_v46  ;;  %v515_v51 = vrot.slane %v514_v49, 1 }
 0x359   :  { %v509_v52 = vmul.f32 0.125, %v508_v50  ;;  %v516_v53 = vadd.f32 %v515_v51, %v514_v49 }
 0x35b   :  { %v517_v0 = vmul.f32 0.125, %v516_v53  ;;  %v518_v54 = vmul.f32 %v509_v52, %v509_v52  ;;  %v521_v58 = vsub.f32 %v497_v36, %v509_v52 }
 0x35d   :  { %v519_v55 = vsub.f32 %v517_v0, %v518_v54 }
 0x35f   :  { %v520_v56 = vmax.f32 %v519_v55, 0.0 }
 0x361   :  { %v522_v57 = vadd.f32 0.001, %v520_v56 }
 0x363   :  { %873 = vrsqrt.f32 %v522_v57 }
 0x36d   :  { %v874_v59 = vpop.eup %873 }
 0x36e   :  { %v524_v61 = vmul.f32 %v874_v59, %v521_v58 }
 0x370   :  { %v532_v63 = vmul.f32 %v700_v60, %v524_v61 }
 0x372   :  { %v540_v1 = vadd.f32 %v701_v62, %v532_v63 }
 0x374   :  { %v541_v2 = vmax.f32 %v540_v1, 0.0 }
 0x376   :  { %v542_v3 = vpack.c.bf16 %v541_v2, %v541_v2 }
 0x378   :  { %824 = vmatmul.mubr.bf16.vlgmr.msra.gmra.mrb[4].mxu1 %v542_v3 }
 0x44b   :  { %v648_v5 = vpop.f32.mrb[4].mxu1 }
 0x44c   :  { %v649_v6 = vadd.f32 %v702_v4, %v648_v5  ;;  %v825_v7 = vpop.f32.mrb[5].mxu1 }
 0x44d   :  { %v651_v8 = vpop.f32.mrb[6].mxu1 }
 0x44e   :  { %654 = vst [vmem:[#allocation11] sm:$0xff] %v649_v6  ;;  %v826_v9 = vpop.f32.mrb[7].mxu1 }
 0x44f   :  { %996 = shalt.err (!%p993_p2)
}
 0x450   :  { %s997_s11 = scalar_lea.hbm %s1247_s12, 128 }
 0x451   :  { %p998_p3 = scmp.ne.s32.totalorder %s1247_s12, %s997_s11  ;;  %p1001_p4 = scmp.lt.u32.totalorder %s997_s11, %s1247_s12 }
 0x453   :  { %p1003_p5 = pnand %p1001_p4, %p998_p3 }
 0x455   :  { %1006 = shalt.err (!%p1003_p5)
}
 0x456   :  { %664 = dma.vmem_to_hbm [thread:$0]  %s662_s20, 128, %s1247_s12, [#allocation4]  }
 0x457   :  { %1013 = dma.done.wait [#allocation4], 128  }
 0x458   :  { %1014 = vsyncadd [#allocation4], 4294967168 }
 0x459   :  { %668 = vsyncpa [#allocation3], 1 }
 0x45a   :  { %669 = vsyncpa [#allocation6], 1 }
 0x45b   :  { %670 = vsyncpa [#allocation9], 1 }
 0x45c   :  { %671 = vsyncpa [#allocation4], 1 }

</bundles_post_ra>
